<compile_context>
chip_gen: v6e
topology: v6e:2x2x1
jax: 0.10.0
libtpu: 0.0.40
codegen_flags: <defaults>
</compile_context>

<pallas_src>
import jax
import jax.numpy as jnp
from jax.experimental import pallas as pl
from jax.experimental.pallas import tpu as pltpu


_NEG_LARGE = -1e30  # finite "-inf": padded vocab columns underflow to exp()=0

_NORM_TYPE_TO_MODE = {
    "local-joint": "sum_logsoftmax",
    "local-separate": "sum_logsoftmax",
    "global-joint-normal": "sum",
    "global-joint-logsoftmax": "sum_logsoftmax",
    "global-separate-normal": "sum",
    "global-separate-logsoftmax": "logsoftmax_sum",
}


def _cdiv(a, b):
    return -(-a // b)


def _round_up(x, m):
    return _cdiv(x, m) * m


def _pad2(x, rows, cols, value=0.0):
    pr, pc = rows - x.shape[0], cols - x.shape[1]
    if pr or pc:
        x = jnp.pad(x, ((0, pr), (0, pc)), constant_values=value)
    return x


def _tpu_profile():
    """(vmem_cap_bytes, tile_b_max, tile_v_max, n_tensorcores) per generation."""
    try:
        kind = jax.devices()[0].device_kind.lower()
    except Exception:
        kind = "v6e"
    if "v7" in kind:
        return 48 * 2**20, 256, 1024, 2          # v7x: 64 MiB VMEM/TC, 2 TCs
    if "v5e" in kind or ("v5" in kind and "lite" in kind):
        return 100 * 2**20, 128, 2048, 1         # v5e: 128 MiB VMEM, 1 TC
    if "v4" in kind or "v5p" in kind or "v5" in kind:
        return 100 * 2**20, 256, 2048, 2         # megacore parts
    return 100 * 2**20, 256, 2048, 1             # v6e default


# ----------------------------- kernels --------------------------------------


def _sum_kernel(t_ref, p_ref, wt_ref, wp_ref, b_ref, o_ref):
    # two accumulating dots == fused [B,2H]@[2H,V] without an HBM weight concat
    acc = jnp.dot(t_ref[...], wt_ref[...], preferred_element_type=jnp.float32)
    acc = acc + jnp.dot(p_ref[...], wp_ref[...],
                        preferred_element_type=jnp.float32)
    o_ref[...] = (acc + b_ref[...]).astype(o_ref.dtype)


def _online_update(logits, m_ref, l_ref):
    m_prev = m_ref[...]
    m_new = jnp.maximum(m_prev, jnp.max(logits, axis=-1, keepdims=True))
    l_ref[...] = l_ref[...] * jnp.exp(m_prev - m_new) + jnp.sum(
        jnp.exp(logits - m_new), axis=-1, keepdims=True)
    m_ref[...] = m_new


def _make_logsoftmax_kernel(separate, resident, nv, tile_v):
    """Single-pass log-softmax kernel (no matmul recompute).

    separate=False: out = LogSoftmax(t@Wt + p@Wp + b)
    separate=True : out = (t@Wt + bt + p@Wp + bp) - lse_t - lse_p
    resident=True : (tile_b, Vp) output strip stays in VMEM across the V axis
                    and is normalized in place at the last V tile.
    resident=False: kernel emits raw (summed) logits + total lse per row; the
                    caller does the elementwise `logits - lse` fixup.
    """

    def kernel(*refs):
        if separate:
            t_ref, p_ref, wt_ref, wp_ref, bt_ref, bp_ref = refs[:6]
            rest = refs[6:]
        else:
            t_ref, p_ref, wt_ref, wp_ref, b_ref = refs[:5]
            rest = refs[5:]
        if resident:
            o_ref, scratch = rest[0], rest[1:]
        else:
            o_ref, lse_ref, scratch = rest[0], rest[1], rest[2:]

        j = pl.program_id(1)

        @pl.when(j == 0)
        def _():
            # scratch is ordered as (m, l[, m, l]); m init -> -1e30, l init -> 0
            for k, s in enumerate(scratch):
                s[...] = (jnp.full_like(s, _NEG_LARGE) if k % 2 == 0
                          else jnp.zeros_like(s))

        t_logits = jnp.dot(t_ref[...], wt_ref[...],
                           preferred_element_type=jnp.float32)
        p_logits = jnp.dot(p_ref[...], wp_ref[...],
                           preferred_element_type=jnp.float32)

        if separate:
            t_logits = t_logits + bt_ref[...]
            p_logits = p_logits + bp_ref[...]
            _online_update(t_logits, scratch[0], scratch[1])
            _online_update(p_logits, scratch[2], scratch[3])
            logits = t_logits + p_logits

            def lse():
                return ((scratch[0][...] + jnp.log(scratch[1][...]))
                        + (scratch[2][...] + jnp.log(scratch[3][...])))
        else:
            logits = t_logits + p_logits + b_ref[...]
            _online_update(logits, scratch[0], scratch[1])

            def lse():
                return scratch[0][...] + jnp.log(scratch[1][...])

        if resident:
            if nv == 1:
                o_ref[...] = logits.astype(o_ref.dtype)
            else:
                off = pl.multiple_of(j * tile_v, 128)
                o_ref[:, pl.ds(off, tile_v)] = logits.astype(o_ref.dtype)

            @pl.when(j == nv - 1)
            def _():
                o_ref[...] = (o_ref[...] - lse()).astype(o_ref.dtype)
        else:
            o_ref[...] = logits.astype(o_ref.dtype)

            @pl.when(j == nv - 1)
            def _():
                lse_ref[...] = lse()

    return kernel


# ----------------------------- wrapper ---------------------------------------


def scorer_forward(trans_output, pred_output, params, norm_type, *,
                   compute_dtype=jnp.bfloat16, tile_b=None, tile_v=None,
                   resident_output=None):
    """Scorer forward pass as a fused, tiled, single-pass Pallas TPU kernel.

    params: {"wt": [H, V], "wp": [H, V], "bt": [1, V] or [V], "bp": ...}
    compute_dtype: matmul operand dtype (bf16 default, MXU-native on v6e/v7x);
                   accumulation, bias add and the log-softmax stay in float32.
    """
    mode = _NORM_TYPE_TO_MODE[norm_type]
    wt, wp = params["wt"], params["wp"]
    bt = params["bt"].reshape(1, -1).astype(jnp.float32)
    bp = params["bp"].reshape(1, -1).astype(jnp.float32)

    B, H = trans_output.shape
    V = wt.shape[1]

    cdtype = (jnp.dtype(compute_dtype) if compute_dtype is not None
              else jnp.dtype(trans_output.dtype))
    ib = cdtype.itemsize
    rb = {4: 8, 2: 16, 1: 32}.get(ib, 8)          # sublane packing granularity

    vmem_cap, tb_max, tv_max, n_cores = _tpu_profile()
    if tile_b is not None:
        tb_max = max(rb, int(tile_b))
    if tile_v is not None:
        tv_max = max(128, int(tile_v))

    # ---- padding-aware, balanced tile selection --------------------------------
    nb = _cdiv(B, tb_max)
    if n_cores > 1 and B > 64:
        nb = max(nb, n_cores)                      # keep both TCs busy (megacore)
    tb = _round_up(_cdiv(B, nb), rb)
    nb = _cdiv(B, tb)

    vp128 = _round_up(V, 128)
    nv = _cdiv(vp128, tv_max)
    tv = _round_up(_cdiv(vp128, nv), 128)
    nv = _cdiv(vp128, tv)
    Vp = nv * tv

    softmax = mode != "sum"
    separate = mode == "logsoftmax_sum"
    n_bias = 2 if separate else 1
    w_bytes = 2 * H * tv * ib                      # wt + wp tiles
    bias_bytes = n_bias * tv * 4

    # ---- resident-output (single-pass, no fixup) feasibility -------------------
    resident = False
    if softmax:
        budget = vmem_cap - (2 << 20) - 2 * (w_bytes + bias_bytes)
        per_row = 2 * (2 * H * ib + Vp * 4)        # activations + f32 strip (x2 buf)
        tb_fit = (budget // per_row) // rb * rb if budget > 0 else 0
        want = (resident_output if resident_output is not None
                else tb_fit >= max(rb, min(tb, 64)))
        resident = bool(want) and tb_fit >= rb
        if resident and tb_fit < tb:
            tb = int(tb_fit)                       # shrink batch tile to fit strip
            nb = _cdiv(B, tb)
    Bp = nb * tb

    # ---- pad / cast operands (copies only when actually required) --------------
    # TODO(synk): for repeated calls, pre-cast / pre-pad the weights once outside
    # scorer_forward (cache params in compute_dtype) to avoid any per-call copy.
    cast = lambda a: a if a.dtype == cdtype else a.astype(cdtype)
    t = _pad2(cast(trans_output), Bp, H)
    p = _pad2(cast(pred_output), Bp, H)
    wt_k = _pad2(cast(wt), H, Vp)
    wp_k = _pad2(cast(wp), H, Vp)

    pad_val = _NEG_LARGE if softmax else 0.0
    if separate:
        biases = (_pad2(bt, 1, Vp, value=pad_val),
                  _pad2(bp, 1, Vp, value=pad_val))
    else:
        biases = (_pad2(bt + bp, 1, Vp, value=pad_val),)

    act_bytes = 2 * tb * H * ib

    # ---------------------------- "sum" mode ------------------------------------
    if mode == "sum":
        need = 2 * (act_bytes + w_bytes + bias_bytes + tb * tv * 4) + (4 << 20)
        vmem_limit = int(min(vmem_cap, max(32 << 20, need)))
        if nb > 1 and nv > 1:
            # weight tile resident across the (inner) batch axis -> W streams once
            grid = (nv, nb)
            amap = lambda j, i: (i, 0)
            wmap = lambda j, i: (0, j)
            omap = lambda j, i: (i, j)
        else:
            grid = (nb, nv)
            amap = lambda i, j: (i, 0)
            wmap = lambda i, j: (0, j)
            omap = lambda i, j: (i, j)

        out = pl.pallas_call(
            _sum_kernel,
            out_shape=jax.ShapeDtypeStruct((Bp, Vp), jnp.float32),
            grid_spec=pltpu.PrefetchScalarGridSpec(
                num_scalar_prefetch=0,
                grid=grid,
                in_specs=[
                    pl.BlockSpec((tb, H), amap),
                    pl.BlockSpec((tb, H), amap),
                    pl.BlockSpec((H, tv), wmap),
                    pl.BlockSpec((H, tv), wmap),
                    pl.BlockSpec((1, tv), wmap),
                ],
                out_specs=pl.BlockSpec((tb, tv), omap),
            ),
            compiler_params=pltpu.CompilerParams(
                dimension_semantics=("parallel", "parallel"),
                vmem_limit_bytes=vmem_limit),
            cost_estimate=pl.CostEstimate(
                flops=4 * Bp * H * Vp,
                transcendentals=0,
                bytes_accessed=int(2 * nv * Bp * H * ib + 2 * H * Vp * ib
                                   + Vp * 4 + Bp * Vp * 4)),
        )(t, p, wt_k, wp_k, biases[0])
        return out[:B, :V]

    # ---------------------- log-softmax modes (single pass) ---------------------
    kernel = _make_logsoftmax_kernel(separate, resident, nv, tv)
    n_scr = 4 if separate else 2
    scratch = [pltpu.VMEM((tb, 1), jnp.float32)] * n_scr

    amap = lambda i, j: (i, 0)
    wmap = lambda i, j: (0, j)
    in_specs = ([pl.BlockSpec((tb, H), amap),
                 pl.BlockSpec((tb, H), amap),
                 pl.BlockSpec((H, tv), wmap),
                 pl.BlockSpec((H, tv), wmap)]
                + [pl.BlockSpec((1, tv), wmap)] * len(biases))

    flops = 4 * Bp * H * Vp
    trans = (2 if separate else 1) * Bp * Vp
    weight_traffic = nb * 2 * H * Vp * ib

    if resident:
        need = (2 * (act_bytes + w_bytes + bias_bytes)
                + 2 * tb * Vp * 4 + n_scr * tb * 4 + (4 << 20))
        vmem_limit = int(min(vmem_cap, max(32 << 20, need)))
        out = pl.pallas_call(
            kernel,
            out_shape=jax.ShapeDtypeStruct((Bp, Vp), jnp.float32),
            grid_spec=pltpu.PrefetchScalarGridSpec(
                num_scalar_prefetch=0,
                grid=(nb, nv),
                in_specs=in_specs,
                out_specs=pl.BlockSpec((tb, Vp), lambda i, j: (i, 0)),
                scratch_shapes=scratch,
            ),
            compiler_params=pltpu.CompilerParams(
                dimension_semantics=("parallel", "arbitrary"),
                vmem_limit_bytes=vmem_limit),
            cost_estimate=pl.CostEstimate(
                flops=flops, transcendentals=trans,
                bytes_accessed=int(2 * Bp * H * ib + weight_traffic
                                   + n_bias * Vp * 4 + Bp * Vp * 4)),
        )(t, p, wt_k, wp_k, *biases)
        return out[:B, :V]

    # Fallback (very large V / forced): emit raw logits + per-row lse in one
    # matmul pass, then do the elementwise fixup in XLA.
    need = (2 * (act_bytes + w_bytes + bias_bytes + tb * tv * 4 + tb * 4)
            + n_scr * tb * 4 + (4 << 20))
    vmem_limit = int(min(vmem_cap, max(32 << 20, need)))
    logits, lse = pl.pallas_call(
        kernel,
        out_shape=(jax.ShapeDtypeStruct((Bp, Vp), jnp.float32),
                   jax.ShapeDtypeStruct((Bp, 1), jnp.float32)),
        grid_spec=pltpu.PrefetchScalarGridSpec(
            num_scalar_prefetch=0,
            grid=(nb, nv),
            in_specs=in_specs,
            out_specs=(pl.BlockSpec((tb, tv), lambda i, j: (i, j)),
                       pl.BlockSpec((tb, 1), lambda i, j: (i, 0))),
            scratch_shapes=scratch,
        ),
        compiler_params=pltpu.CompilerParams(
            dimension_semantics=("parallel", "arbitrary"),
            vmem_limit_bytes=vmem_limit),
        cost_estimate=pl.CostEstimate(
            flops=flops, transcendentals=trans,
            bytes_accessed=int(2 * Bp * H * ib + weight_traffic
                               + n_bias * Vp * 4 + Bp * Vp * 4 + Bp * 4)),
    )(t, p, wt_k, wp_k, *biases)
    return logits[:B, :V] - lse[:B]


# ----------------------------- reference & test -------------------------------


def _reference_forward(trans_output, pred_output, params, norm_type):
    t_proj = trans_output @ params["wt"] + params["bt"].reshape(1, -1)
    p_proj = pred_output @ params["wp"] + params["bp"].reshape(1, -1)
    mode = _NORM_TYPE_TO_MODE[norm_type]
    if mode == "sum":
        return t_proj + p_proj
    if mode == "sum_logsoftmax":
        return jax.nn.log_softmax(t_proj + p_proj, axis=1)
    return (jax.nn.log_softmax(t_proj, axis=1)
            + jax.nn.log_softmax(p_proj, axis=1))


if __name__ == "__main__":
    def make_inputs(key, B, H, V):
        k_t, k_p, k_wt, k_wp, k_bt, k_bp = jax.random.split(key, 6)
        t = jax.random.normal(k_t, (B, H), dtype=jnp.float32)
        p = jax.random.normal(k_p, (B, H), dtype=jnp.float32)
        params = {
            "wt": jax.random.normal(k_wt, (H, V), dtype=jnp.float32) * 0.1,
            "wp": jax.random.normal(k_wp, (H, V), dtype=jnp.float32) * 0.1,
            "bt": jax.random.normal(k_bt, (1, V), dtype=jnp.float32) * 0.1,
            "bp": jax.random.normal(k_bp, (1, V), dtype=jnp.float32) * 0.1,
        }
        return t, p, params

    key = jax.random.PRNGKey(0)
    k1, k2 = jax.random.split(key)
    failures = []

    def check(tag, out, ref, atol, rtol):
        out = jax.block_until_ready(out)
        if out.shape != ref.shape:
            failures.append(f"{tag} shape {out.shape} vs {ref.shape}")
            return
        if not jnp.allclose(out, ref, atol=atol, rtol=rtol):
            err = float(jnp.max(jnp.abs(out - ref)))
            failures.append(f"{tag} max_err={err:.3e}")

    # small spec-level shape + one exercising padding / multi-tile batch
    for kk, B, H, V in ((k1, 8, 32, 128), (k2, 272, 32, 640)):
        t, p, params = make_inputs(kk, B, H, V)
        for norm_type in _NORM_TYPE_TO_MODE:
            ref = _reference_forward(t, p, params, norm_type)

            out = scorer_forward(t, p, params, norm_type,
                                 compute_dtype=jnp.float32)
            check(f"f32 B={B} V={V} {norm_type}", out, ref, 2e-4, 2e-4)

            out_bf = scorer_forward(t, p, params, norm_type)  # default bf16
            check(f"bf16 B={B} V={V} {norm_type}", out_bf, ref, 6e-2, 6e-2)

    # streamed-V fallback path (logits + lse, XLA fixup), multi-tile vocab
    t, p, params = make_inputs(k2, 272, 32, 640)
    for norm_type in ("local-joint", "global-separate-logsoftmax"):
        ref = _reference_forward(t, p, params, norm_type)
        out = scorer_forward(t, p, params, norm_type, compute_dtype=jnp.float32,
                             tile_v=128, resident_output=False)
        check(f"fallback B=272 V=640 {norm_type}", out, ref, 3e-4, 3e-4)

    if failures:
        for f in failures:
            print("MISMATCH", f)
    else:
        print("KERNEL_OK")
</pallas_src>

<mosaic_0001>
module attributes {stable_mosaic.version = 11 : i64} {
  func.func @kernel(%arg0: i32, %arg1: i32, %arg2: memref<8x32xf32, #tpu.memory_space<vmem>>, %arg3: memref<8x32xf32, #tpu.memory_space<vmem>>, %arg4: memref<32x128xf32, #tpu.memory_space<vmem>>, %arg5: memref<32x128xf32, #tpu.memory_space<vmem>>, %arg6: memref<1x128xf32, #tpu.memory_space<vmem>>, %arg7: memref<8x128xf32, #tpu.memory_space<vmem>>, %arg8: memref<8x1xf32, #tpu.memory_space<vmem>>, %arg9: memref<8x1xf32, #tpu.memory_space<vmem>>) attributes {dimension_semantics = [#tpu.dimension_semantics<parallel>, #tpu.dimension_semantics<arbitrary>], iteration_bounds = array<i64: 1, 1>, scalar_prefetch = 0 : i64, scratch_operands = 2 : i64, tpu.core_type = #tpu.core_type<tc>, window_params = [{transform_indices = @transform_0, window_bounds = array<i64: 8, 32>}, {transform_indices = @transform_1, window_bounds = array<i64: 8, 32>}, {transform_indices = @transform_2, window_bounds = array<i64: 32, 128>}, {transform_indices = @transform_3, window_bounds = array<i64: 32, 128>}, {transform_indices = @transform_4, window_bounds = array<i64: 1, 128>}, {transform_indices = @transform_5, window_bounds = array<i64: 8, 128>}]} {
    %c0_i32 = arith.constant 0 : i32
    %0 = arith.cmpi eq, %arg1, %c0_i32 : i32
    %1 = arith.extui %0 : i1 to i32
    %c0_i32_0 = arith.constant 0 : i32
    %2 = arith.cmpi ne, %1, %c0_i32_0 : i32
    scf.if %2 {
      %cst_25 = arith.constant -1.000000e+30 : f32
      %33 = vector.broadcast %cst_25 : f32 to vector<8x1xf32>
      %c0_26 = arith.constant 0 : index
      %c0_27 = arith.constant 0 : index
      %34 = vector.load %arg8[%c0_26, %c0_27] : memref<8x1xf32, #tpu.memory_space<vmem>>, vector<8x1xf32>
      tpu.vector_store %arg8[%c0_26, %c0_27], %33 {strides = array<i32>} : memref<8x1xf32, #tpu.memory_space<vmem>>, vector<8x1xf32>,
      %cst_28 = arith.constant 0.000000e+00 : f32
      %35 = vector.broadcast %cst_28 : f32 to vector<8x1xf32>
      %c0_29 = arith.constant 0 : index
      %c0_30 = arith.constant 0 : index
      %36 = vector.load %arg9[%c0_29, %c0_30] : memref<8x1xf32, #tpu.memory_space<vmem>>, vector<8x1xf32>
      tpu.vector_store %arg9[%c0_29, %c0_30], %35 {strides = array<i32>} : memref<8x1xf32, #tpu.memory_space<vmem>>, vector<8x1xf32>,
    } else {
    }
    %c0 = arith.constant 0 : index
    %c0_1 = arith.constant 0 : index
    %3 = vector.load %arg2[%c0, %c0_1] : memref<8x32xf32, #tpu.memory_space<vmem>>, vector<8x32xf32>
    %c0_2 = arith.constant 0 : index
    %c0_3 = arith.constant 0 : index
    %4 = vector.load %arg4[%c0_2, %c0_3] : memref<32x128xf32, #tpu.memory_space<vmem>>, vector<32x128xf32>
    %cst = arith.constant dense<0.000000e+00> : vector<8x128xf32>
    %5 = tpu.matmul %3, %4, %cst {dimension_numbers = #tpu.dot_dimension_numbers<[1], [0], [0], [1], [0, 0, 1, 1], [], []>} : vector<8x32xf32>, vector<32x128xf32>, vector<8x128xf32> -> vector<8x128xf32>
    %c0_4 = arith.constant 0 : index
    %c0_5 = arith.constant 0 : index
    %6 = vector.load %arg3[%c0_4, %c0_5] : memref<8x32xf32, #tpu.memory_space<vmem>>, vector<8x32xf32>
    %c0_6 = arith.constant 0 : index
    %c0_7 = arith.constant 0 : index
    %7 = vector.load %arg5[%c0_6, %c0_7] : memref<32x128xf32, #tpu.memory_space<vmem>>, vector<32x128xf32>
    %cst_8 = arith.constant dense<0.000000e+00> : vector<8x128xf32>
    %8 = tpu.matmul %6, %7, %cst_8 {dimension_numbers = #tpu.dot_dimension_numbers<[1], [0], [0], [1], [0, 0, 1, 1], [], []>} : vector<8x32xf32>, vector<32x128xf32>, vector<8x128xf32> -> vector<8x128xf32>
    %9 = arith.addf %5, %8 : vector<8x128xf32>
    %c0_9 = arith.constant 0 : index
    %c0_10 = arith.constant 0 : index
    %10 = vector.load %arg6[%c0_9, %c0_10] : memref<1x128xf32, #tpu.memory_space<vmem>>, vector<1x128xf32>
    %11 = vector.broadcast %10 : vector<1x128xf32> to vector<8x128xf32>
    %12 = arith.addf %9, %11 : vector<8x128xf32>
    %c0_11 = arith.constant 0 : index
    %c0_12 = arith.constant 0 : index
    %13 = vector.load %arg8[%c0_11, %c0_12] : memref<8x1xf32, #tpu.memory_space<vmem>>, vector<8x1xf32>
    %cst_13 = arith.constant dense<0xFF800000> : vector<8xf32>
    %14 = vector.multi_reduction <maximumf>, %12, %cst_13 [1] : vector<8x128xf32> to vector<8xf32>
    %15 = vector.shape_cast %14 : vector<8xf32> to vector<8x1xf32>
    %16 = arith.maximumf %13, %15 : vector<8x1xf32>
    %c0_14 = arith.constant 0 : index
    %c0_15 = arith.constant 0 : index
    %17 = vector.load %arg9[%c0_14, %c0_15] : memref<8x1xf32, #tpu.memory_space<vmem>>, vector<8x1xf32>
    %18 = arith.subf %13, %16 : vector<8x1xf32>
    %19 = math.exp %18 : vector<8x1xf32>
    %20 = arith.mulf %17, %19 : vector<8x1xf32>
    %21 = vector.broadcast %16 : vector<8x1xf32> to vector<8x128xf32>
    %22 = arith.subf %12, %21 : vector<8x128xf32>
    %23 = math.exp %22 : vector<8x128xf32>
    %cst_16 = arith.constant dense<0.000000e+00> : vector<8xf32>
    %24 = vector.multi_reduction <add>, %23, %cst_16 [1] : vector<8x128xf32> to vector<8xf32>
    %25 = vector.shape_cast %24 : vector<8xf32> to vector<8x1xf32>
    %26 = arith.addf %20, %25 : vector<8x1xf32>
    %c0_17 = arith.constant 0 : index
    %c0_18 = arith.constant 0 : index
    %27 = vector.load %arg9[%c0_17, %c0_18] : memref<8x1xf32, #tpu.memory_space<vmem>>, vector<8x1xf32>
    tpu.vector_store %arg9[%c0_17, %c0_18], %26 {strides = array<i32>} : memref<8x1xf32, #tpu.memory_space<vmem>>, vector<8x1xf32>,
    %c0_19 = arith.constant 0 : index
    %c0_20 = arith.constant 0 : index
    %28 = vector.load %arg8[%c0_19, %c0_20] : memref<8x1xf32, #tpu.memory_space<vmem>>, vector<8x1xf32>
    tpu.vector_store %arg8[%c0_19, %c0_20], %16 {strides = array<i32>} : memref<8x1xf32, #tpu.memory_space<vmem>>, vector<8x1xf32>,
    %c0_21 = arith.constant 0 : index
    %c0_22 = arith.constant 0 : index
    %29 = vector.load %arg7[%c0_21, %c0_22] : memref<8x128xf32, #tpu.memory_space<vmem>>, vector<8x128xf32>
    tpu.vector_store %arg7[%c0_21, %c0_22], %12 {strides = array<i32>} : memref<8x128xf32, #tpu.memory_space<vmem>>, vector<8x128xf32>,
    %c0_i32_23 = arith.constant 0 : i32
    %30 = arith.cmpi eq, %arg1, %c0_i32_23 : i32
    %31 = arith.extui %30 : i1 to i32
    %c0_i32_24 = arith.constant 0 : i32
    %32 = arith.cmpi ne, %31, %c0_i32_24 : i32
    scf.if %32 {
      %c0_25 = arith.constant 0 : index
      %c0_26 = arith.constant 0 : index
      %33 = vector.load %arg7[%c0_25, %c0_26] : memref<8x128xf32, #tpu.memory_space<vmem>>, vector<8x128xf32>
      %c0_27 = arith.constant 0 : index
      %c0_28 = arith.constant 0 : index
      %34 = vector.load %arg8[%c0_27, %c0_28] : memref<8x1xf32, #tpu.memory_space<vmem>>, vector<8x1xf32>
      %c0_29 = arith.constant 0 : index
      %c0_30 = arith.constant 0 : index
      %35 = vector.load %arg9[%c0_29, %c0_30] : memref<8x1xf32, #tpu.memory_space<vmem>>, vector<8x1xf32>
      %36 = math.log %35 : vector<8x1xf32>
      %37 = arith.addf %34, %36 : vector<8x1xf32>
      %38 = vector.broadcast %37 : vector<8x1xf32> to vector<8x128xf32>
      %39 = arith.subf %33, %38 : vector<8x128xf32>
      %c0_31 = arith.constant 0 : index
      %c0_32 = arith.constant 0 : index
      %40 = vector.load %arg7[%c0_31, %c0_32] : memref<8x128xf32, #tpu.memory_space<vmem>>, vector<8x128xf32>
      tpu.vector_store %arg7[%c0_31, %c0_32], %39 {strides = array<i32>} : memref<8x128xf32, #tpu.memory_space<vmem>>, vector<8x128xf32>,
    } else {
    }
    return
  }
  func.func @transform_0(%arg0: i32, %arg1: i32) -> (i32, i32) {
    %c0_i32 = arith.constant 0 : i32
    %c0_i32_0 = arith.constant 0 : i32
    return %arg0, %c0_i32 : i32, i32
  }
  func.func @transform_1(%arg0: i32, %arg1: i32) -> (i32, i32) {
    %c0_i32 = arith.constant 0 : i32
    %c0_i32_0 = arith.constant 0 : i32
    return %arg0, %c0_i32 : i32, i32
  }
  func.func @transform_2(%arg0: i32, %arg1: i32) -> (i32, i32) {
    %c0_i32 = arith.constant 0 : i32
    %c0_i32_0 = arith.constant 0 : i32
    return %c0_i32, %arg1 : i32, i32
  }
  func.func @transform_3(%arg0: i32, %arg1: i32) -> (i32, i32) {
    %c0_i32 = arith.constant 0 : i32
    %c0_i32_0 = arith.constant 0 : i32
    return %c0_i32, %arg1 : i32, i32
  }
  func.func @transform_4(%arg0: i32, %arg1: i32) -> (i32, i32) {
    %c0_i32 = arith.constant 0 : i32
    %c0_i32_0 = arith.constant 0 : i32
    return %c0_i32, %arg1 : i32, i32
  }
  func.func @transform_5(%arg0: i32, %arg1: i32) -> (i32, i32) {
    %c0_i32 = arith.constant 0 : i32
    %c0_i32_0 = arith.constant 0 : i32
    return %arg0, %c0_i32 : i32, i32
  }
}

</mosaic_0001>

<bundles_post_ra>
// kernel: tpu_custom_call.1
= control target key start
LH: loop header
LB: loop body
LE: loop exit
PB: predicated region body
PF: predicated region fallthrough
CT: control target
= control target key end

     0   :  { %10 = vsyncpa [#allocation5], 0  ;;  %s526_s0 = inlined_call_operand.hbm [shape: f32[8,32], index: 0, kind: input, shape index: {}]   ;;  %s527_s1 = inlined_call_operand.hbm [shape: f32[8,32], index: 1, kind: input, shape index: {}]   ;;  %s528_s2 = inlined_call_operand.hbm [shape: f32[32,128], index: 2, kind: input, shape index: {}]   ;;  %s529_s3 = inlined_call_operand.hbm [shape: f32[32,128], index: 3, kind: input, shape index: {}]   ;;  %s530_s4 = inlined_call_operand.vmem [shape: f32[1,128], index: 4, kind: input, shape index: {}]   ;;  %s531_s5 = inlined_call_operand.hbm [shape: f32[8,128], index: 5, kind: output, shape index: {}]  }
   0x1   :  { %11 = vsyncpa [#allocation8], 0 }
   0x2   :  { %12 = vsyncpa [#allocation11], 0 }
   0x3   :  { %13 = vsyncpa [#allocation6], 0  ;;  %s463_s18 = smov [#allocation7]   ;;  %s464_s20 = smov [#allocation4]  }
   0x4   :  { %s30_s19 = sshll.u32 %s463_s18, 4  ;;  %s20_s21 = sshll.u32 %s464_s20, 4  ;;  %s31_s19 = int_to_ptr.vmem [resolvable:$true] %s30_s19  ;;  %s21_s21 = int_to_ptr.vmem [resolvable:$true] %s20_s21 }
   0x5   :  { %s363_s22 = scalar_lea.vmem %s31_s19, 128  ;;  %p368_p1 = scmp.lt.s32.totalorder %s31_s19, %s31_s19 }
   0x6   :  { %p364_p0 = scmp.ne.s32.totalorder %s31_s19, %s363_s22  ;;  %p369_p2 = scmp.lt.s32.totalorder %s363_s22, %s363_s22 }
   0x8   :  { %p370_p3 = por %p369_p2, %p368_p1 }
   0xa   :  { %p371_p4 = pnand %p370_p3, %p364_p0 }
   0xc   :  { %374 = shalt.err (!%p371_p4)
}
   0xd   :  { %33 = dma.hbm_to_vmem [thread:$0]  %s527_s1, 128, %s31_s19, [#allocation8]  }
   0xe   :  { %s383_s25 = scalar_lea.vmem %s21_s21, 128  ;;  %p388_p6 = scmp.lt.s32.totalorder %s21_s21, %s21_s21 }
   0xf   :  { %p384_p5 = scmp.ne.s32.totalorder %s21_s21, %s383_s25  ;;  %p389_p7 = scmp.lt.s32.totalorder %s383_s25, %s383_s25 }
  0x11   :  { %p390_p8 = por %p389_p7, %p388_p6 }
  0x13   :  { %p391_p9 = pnand %p390_p8, %p384_p5 }
  0x15   :  { %394 = shalt.err (!%p391_p9)
}
  0x16   :  { %23 = dma.hbm_to_vmem [thread:$0]  %s526_s0, 128, %s21_s21, [#allocation5]  }
  0x17   :  { %s465_s28 = smov [#allocation9]  }
  0x18   :  { %s39_s29 = sshll.u32 %s465_s28, 4  ;;  %s40_s29 = int_to_ptr.vmem [resolvable:$true] %s39_s29 }
  0x19   :  { %s403_s30 = scalar_lea.vmem %s40_s29, 512  ;;  %p408_p11 = scmp.lt.s32.totalorder %s40_s29, %s40_s29 }
  0x1a   :  { %p404_p10 = scmp.ne.s32.totalorder %s40_s29, %s403_s30  ;;  %p409_p12 = scmp.lt.s32.totalorder %s403_s30, %s403_s30 }
  0x1c   :  { %p410_p13 = por %p409_p12, %p408_p11 }
  0x1e   :  { %p411_p0 = pnand %p410_p13, %p404_p10 }
  0x20   :  { %414 = shalt.err (!%p411_p0)
}
  0x21   :  { %s466_s1 = smov 128   ;;  %s467_s6 = smov 8  }
  0x22   :  { %45 = dma.hbm_to_vmem [thread:$0]  %s528_s2, 512, %s40_s29, [#allocation8], %s466_s1, %s466_s1, %s467_s6  }
  0x23   :  { %s468_s9 = smov [#allocation10]  }
  0x24   :  { %s51_s10 = sshll.u32 %s468_s9, 4  ;;  %s52_s10 = int_to_ptr.vmem [resolvable:$true] %s51_s10 }
  0x25   :  { %s423_s0 = scalar_lea.vmem %s52_s10, 512  ;;  %p428_p2 = scmp.lt.s32.totalorder %s52_s10, %s52_s10 }
  0x26   :  { %p424_p1 = scmp.ne.s32.totalorder %s52_s10, %s423_s0  ;;  %p429_p3 = scmp.lt.s32.totalorder %s423_s0, %s423_s0 }
  0x28   :  { %p430_p4 = por %p429_p3, %p428_p2 }
  0x2a   :  { %p431_p5 = pnand %p430_p4, %p424_p1 }
  0x2c   :  { %434 = shalt.err (!%p431_p5)
}
  0x2d   :  { %57 = dma.hbm_to_vmem [thread:$0]  %s529_s3, 512, %s52_s10, [#allocation11], %s466_s1, %s466_s1, %s467_s6  }
  0x2e   :  { %455 = dma.done.wait [#allocation5], 128  }
  0x2f   :  { %456 = vsyncadd [#allocation5], 4294967168 }
  0x30   :  { %457 = dma.done.wait [#allocation8], 640  }
  0x31   :  { %458 = vsyncadd [#allocation8], 4294966656 }
  0x32   :  { %459 = dma.done.wait [#allocation11], 512  }
  0x33   :  { %460 = vsyncadd [#allocation11], 4294966784  ;;  %v469_v0 = vmov 0.0   ;;  %vm470_vm0 = vmmov 0   ;;  %v88_v1 = vld [vmem:[#allocation10 + $0x18] sm:$0xff]  ;;  %v87_v3 = vld [vmem:[#allocation10 + $0x10] sm:$0xff] }
  0x34   :  { %314 = vmatprep.subr.mxu0 %v469_v0  ;;  %325 = vmatprep.subr.mxu1 %v469_v0  ;;  %v83_v2 = vld [vmem:[#allocation9 + $0x18] sm:$0xff]  ;;  %v82_v4 = vld [vmem:[#allocation9 + $0x10] sm:$0xff]  ;;  %v86_v5 = vld [vmem:[#allocation10 + $0x8] sm:$0xff]  ;;  %vm89_vm1 = vcmask 261120   ;;  %vm76_vm2 = vcmask 7168   ;;  %v472_v19 = vmov 0  }
  0x35   :  { %322 = vmatprep.mubr.msk.f32.mxu0 %vm470_vm0, %v469_v0  ;;  %333 = vmatprep.mubr.msk.f32.mxu1 %vm470_vm0, %v469_v0  ;;  %v81_v6 = vld [vmem:[#allocation9 + $0x8] sm:$0xff]  ;;  %v85_v7 = vld [vmem:[#allocation10] sm:$0xff]  ;;  %v84_v9 = vld [vmem:[#allocation7] sm:$0xff]  ;;  %v471_v11 = vmov -1e+30   ;;  %78 = vst.msk [vmem:[#allocation3] sm:$0xff] %vm76_vm2, %v469_v0 }
  0x36   :  { %315 = vmatpush3.msra.mxu0 %v88_v1  ;;  %326 = vmatpush3.msra.mxu1 %v83_v2  ;;  %v80_v8 = vld [vmem:[#allocation9] sm:$0xff]  ;;  %v79_v10 = vld [vmem:[#allocation4] sm:$0xff]  ;;  %77 = vst.msk [vmem:[#allocation2] sm:$0xff] %vm76_vm2, %v471_v11 }
  0x37   :  { %316 = vmatprep.subr.mxu0 %v469_v0  ;;  %327 = vmatprep.subr.mxu1 %v469_v0  ;;  %v303_v14 = vld [vmem:[%s530_s4] ss:$0 sm:$0xff]  ;;  %s473_s4 = smov [#allocation12]  }
  0x38   :  { %317 = vmatpush3.msra.mxu0 %v87_v3  ;;  %328 = vmatpush3.msra.mxu1 %v82_v4  ;;  %s290_s13 = sshll.u32 %s473_s4, 4  ;;  %s291_s13 = int_to_ptr.vmem [resolvable:$true] %s290_s13 }
  0x39   :  { %318 = vmatprep.subr.mxu0 %v469_v0  ;;  %329 = vmatprep.subr.mxu1 %v469_v0  ;;  %s435_s14 = scalar_lea.vmem %s291_s13, 128  ;;  %p440_p7 = scmp.lt.s32.totalorder %s291_s13, %s291_s13 }
  0x3a   :  { %319 = vmatpush3.msra.mxu0 %v86_v5  ;;  %330 = vmatpush3.msra.mxu1 %v81_v6  ;;  %p436_p6 = scmp.ne.s32.totalorder %s291_s13, %s435_s14  ;;  %p441_p8 = scmp.lt.s32.totalorder %s435_s14, %s435_s14 }
  0x3b   :  { %320 = vmatprep.subr.mxu0 %v469_v0  ;;  %331 = vmatprep.subr.mxu1 %v469_v0 }
  0x3c   :  { %321 = vmatpush3.msra.mxu0 %v85_v7  ;;  %332 = vmatpush3.msra.mxu1 %v80_v8  ;;  %v248_v30 = vld [vmem:[#allocation3] sm:$0xff]  ;;  %p442_p9 = por %p441_p8, %p440_p7 }
  0x3d   :  { %323 = vmatmul.mubr.msk.f32.vlgmr.msra.gmra.mxu0 %vm89_vm1, %v84_v9  ;;  %334 = vmatmul.mubr.msk.f32.vlgmr.msra.gmra.mxu1 %vm89_vm1, %v79_v10  ;;  %v244_v20 = vld [vmem:[#allocation2] sm:$0xff] }
  0x3e   :  { %347 = vset.pattern.permute.xlu0 %v472_v19  ;;  %348 = vset.pattern.permute.xlu1 %v472_v19  ;;  %p443_p10 = pnand %p442_p9, %p436_p6 }
  0xfd   :  { %v159_v12 = vpop.f32.mrf.mxu0  ;;  %v232_v13 = vpop.f32.mrf.mxu1 }
  0xfe   :  { %v233_v15 = vadd.f32 %v232_v13, %v159_v12 }
  0xff   :  { %v324_v16 = vpop.f32.mrf.mxu0  ;;  %v335_v17 = vpop.f32.mrf.mxu1 }
 0x100   :  { %v243_v18 = vadd.f32 %v303_v14, %v233_v15 }
 0x102   :  { %245 = vmax.xlane.f32.xlu0 %v243_v18 }
 0x18b   :  { %v246_v21 = vpop.xlane.xlu0 %245 }
 0x18c   :  { %v247_v22 = vmax.f32 %v244_v20, %v246_v21 }
 0x18e   :  { %v249_v23 = vsub.f32 %v244_v20, %v247_v22  ;;  %266 = vst.msk [vmem:[#allocation2] sm:$0xff] %vm76_vm2, %v247_v22  ;;  %255 = vperm.xlu0 %347, %v247_v22  }
 0x190   :  { %v250_v28 = vmul.f32 1.442695, %v249_v23 }
 0x195   :  { %v272_v37 = vld [vmem:[#allocation2] sm:$0xff] }
 0x209   :  { %v256_v24 = vpop.permute.xlu0 %255 }
 0x20a   :  { %v258_v25 = vsub.f32 %v243_v18, %v256_v24 }
 0x20c   :  { %v259_v26 = vmul.f32 1.442695, %v258_v25 }
 0x20e   :  { %349 = vpow2.f32 %v259_v26 }
 0x20f   :  { %351 = vpow2.f32 %v250_v28 }
 0x21b   :  { %v350_v27 = vpop.eup %349 }
 0x21c   :  { %261 = vadd.xlane.f32.xlu1 %v350_v27  ;;  %v352_v29 = vpop.eup %351 }
 0x21d   :  { %v252_v31 = vmul.f32 %v352_v29, %v248_v30 }
 0x2a5   :  { %v262_v32 = vpop.xlane.xlu1 %261 }
 0x2a6   :  { %v263_v33 = vadd.f32 %v262_v32, %v252_v31 }
 0x2a8   :  { %265 = vst.msk [vmem:[#allocation3] sm:$0xff] %vm76_vm2, %v263_v33 }
 0x2af   :  { %v273_v34 = vld [vmem:[#allocation3] sm:$0xff] }
 0x2b0   :  { %353 = vlog2.f32 %v273_v34 }
 0x2bd   :  { %v354_v35 = vpop.eup %353 }
 0x2be   :  { %v275_v36 = vmul.f32 0.6931472, %v354_v35 }
 0x2c0   :  { %v276_v38 = vadd.f32 %v275_v36, %v272_v37 }
 0x2c2   :  { %279 = vperm.xlu1 %348, %v276_v38  }
 0x33d   :  { %v280_v39 = vpop.permute.xlu1 %279 }
 0x33e   :  { %v282_v40 = vsub.f32 %v243_v18, %v280_v39 }
 0x340   :  { %283 = vst [vmem:[#allocation12] sm:$0xff] %v282_v40 }
 0x341   :  { %446 = shalt.err (!%p443_p10)
}
 0x342   :  { %293 = dma.vmem_to_hbm [thread:$0]  %s291_s13, 128, %s531_s5, [#allocation6]  }
 0x343   :  { %461 = dma.done.wait [#allocation6], 128  }
 0x344   :  { %462 = vsyncadd [#allocation6], 4294967168 }
 0x345   :  { %297 = vsyncpa [#allocation5], 1 }
 0x346   :  { %298 = vsyncpa [#allocation8], 1 }
 0x347   :  { %299 = vsyncpa [#allocation11], 1 }
 0x348   :  { %300 = vsyncpa [#allocation6], 1 }

</bundles_post_ra>
